<compile_context>
chip_gen: v6e
topology: v6e:2x2x1
jax: 0.10.0
libtpu: 0.0.40
codegen_flags: <defaults>
</compile_context>

<pallas_src>
import math

import jax
import jax.numpy as jnp
import numpy as np
from jax.experimental import pallas as pl
from jax.experimental.pallas import tpu as pltpu


def _round_up(x, m):
    return ((x + m - 1) // m) * m


def _largest_aligned_divisor(dim, cap):
    """Largest multiple-of-128 divisor of `dim` (dim % 128 == 0) that is <= cap."""
    best = 128
    for t in range(128, min(dim, cap) + 1, 128):
        if dim % t == 0:
            best = t
    return best


def _vmem_capacity_bytes():
    """Physical VMEM per core; conservative (v7x = 64 MiB) if the query fails."""
    try:
        info = pltpu.get_tpu_info()
        cap = getattr(info, "vmem_capacity_bytes", None)
        if cap:
            return int(cap)
    except Exception:
        pass
    return 64 * 1024 * 1024


# ----------------------------------------------------------------------------
# Kernels
# ----------------------------------------------------------------------------
def _proj_kernel_acc(x_ref, w_ref, b_ref, o_ref, acc_ref):
    """(TM, TN) output tile; grid axis 2 is the K reduction (innermost)."""
    k = pl.program_id(2)

    @pl.when(k == 0)
    def _():
        acc_ref[...] = jnp.zeros_like(acc_ref)

    # bf16 operands on the MXU, f32 accumulation.
    acc_ref[...] += jnp.dot(x_ref[...], w_ref[...], preferred_element_type=jnp.float32)

    @pl.when(k == pl.num_programs(2) - 1)
    def _():
        o_ref[...] = (acc_ref[...] + b_ref[...]).astype(o_ref.dtype)


def _proj_kernel_noacc(x_ref, w_ref, b_ref, o_ref):
    """Fast path when the whole K reduction fits in one tile: no scratch acc."""
    o_ref[...] = (
        jnp.dot(x_ref[...], w_ref[...], preferred_element_type=jnp.float32) + b_ref[...]
    ).astype(o_ref.dtype)


# ----------------------------------------------------------------------------
# Wrapper
# ----------------------------------------------------------------------------
def projection2d_pallas(x, w_t, b, out_size, *, force_pallas=False):
    """Projection2D forward.

    x:   (B, in_ch, in_size, in_size) float32
    w_t: (in_size**2, out_size**2)  -- PyTorch Linear weight, transposed to (in, out)
    b:   (out_size**2,) or (1, out_size**2)
    returns: (B, in_ch, out_size, out_size) float32
    """
    B, C, H, W = x.shape
    K = H * W
    N = out_size * out_size
    M = B * C

    # Tiny-problem fallback: a single sub-microsecond grid step is dominated by
    # pallas_call launch and pad/slice HBM passes; XLA's fused dot is faster.
    if not force_pallas and (M * K * N) < (1 << 20):
        y = jnp.dot(x.reshape(M, K), w_t) + b.reshape(1, -1)
        return y.reshape(B, C, out_size, out_size)

    # bf16 operands in HBM (GEMM is HBM-bound on every generation), f32 MXU accumulate.
    # TODO(synk): PyTorch's Linear is f32; switch to f32 MXU passes if bit-level parity matters.
    xm = x.reshape(M, K).astype(jnp.bfloat16)
    wt = w_t.astype(jnp.bfloat16)
    bb = b.reshape(1, N).astype(jnp.float32)

    # Zero-pad K and N to multiples of 128: K padding contributes exactly 0 to the
    # dot; N padding is sliced off after the kernel. Keeps every tile (8,128)-legal
    # and the output slab lane-dense (unmasked vst).
    K_pad = _round_up(K, 128)
    N_pad = _round_up(N, 128)
    if K_pad != K:
        xm = jnp.pad(xm, ((0, 0), (0, K_pad - K)))
        wt = jnp.pad(wt, ((0, K_pad - K), (0, 0)))
    if N_pad != N:
        wt = jnp.pad(wt, ((0, 0), (0, N_pad - N)))
        bb = jnp.pad(bb, ((0, 0), (0, N_pad - N)))

    # ---- generation-aware tile selection -----------------------------------
    cap = _vmem_capacity_bytes()
    big_vmem = cap >= (96 << 20)          # v5e / v6e: 128 MiB; v7x: 64 MiB
    tm_cap = 512 if big_vmem else 256
    tn_cap = 1024 if big_vmem else 512
    tk_cap = 2048

    TK = _largest_aligned_divisor(K_pad, tk_cap)
    TN = _largest_aligned_divisor(N_pad, tn_cap)
    TM = min(tm_cap, _round_up(M, 128))   # always a multiple of 128 (full MXU passes)

    # Guarantee >=2 parallel tiles where possible so a 2-TC chip (v7x) can shard them.
    if (_round_up(M, TM) // TM) * (N_pad // TN) == 1:
        if TN % 256 == 0:
            TN //= 2
        elif TM % 256 == 0:
            TM //= 2

    M_pad = _round_up(M, TM)
    if M_pad != M:
        xm = jnp.pad(xm, ((0, M_pad - M), (0, 0)))

    grid_m, grid_n, grid_k = M_pad // TM, N_pad // TN, K_pad // TK

    # ---- VMEM budget from actual block byte sizes ---------------------------
    blk_bytes = (
        2 * (TM * TK * 2)        # x tile, bf16, double-buffered
        + 2 * (TK * TN * 2)      # w tile, bf16, double-buffered
        + 2 * (TN * 4)           # bias tile, f32, double-buffered
        + 2 * (TM * TN * 4)      # out tile, f32, double-buffered
        + (TM * TN * 4)          # f32 accumulator scratch (multi-K path only)
    )
    vmem_bytes = blk_bytes + (2 << 20)            # Mosaic internal scratch headroom
    vmem_bytes = max(vmem_bytes, 16 << 20)
    vmem_bytes = min(vmem_bytes, (cap * 3) // 4)  # stay well below physical VMEM

    compiler_params_2d = pltpu.CompilerParams(
        dimension_semantics=("parallel", "parallel"),
        vmem_limit_bytes=vmem_bytes,
    )
    compiler_params_3d = pltpu.CompilerParams(
        dimension_semantics=("parallel", "parallel", "arbitrary"),
        vmem_limit_bytes=vmem_bytes,
    )

    if grid_k == 1:
        # K fits in one tile: no accumulator scratch, no init/finalize branches.
        out_flat = pl.pallas_call(
            _proj_kernel_noacc,
            out_shape=jax.ShapeDtypeStruct((M_pad, N_pad), jnp.float32),
            grid_spec=pltpu.PrefetchScalarGridSpec(
                num_scalar_prefetch=0,
                grid=(grid_m, grid_n),
                in_specs=[
                    pl.BlockSpec((TM, TK), lambda i, j: (i, 0)),
                    pl.BlockSpec((TK, TN), lambda i, j: (0, j)),
                    pl.BlockSpec((1, TN), lambda i, j: (0, j)),
                ],
                out_specs=pl.BlockSpec((TM, TN), lambda i, j: (i, j)),
            ),
            compiler_params=compiler_params_2d,
        )(xm, wt, bb)
    else:
        out_flat = pl.pallas_call(
            _proj_kernel_acc,
            out_shape=jax.ShapeDtypeStruct((M_pad, N_pad), jnp.float32),
            grid_spec=pltpu.PrefetchScalarGridSpec(
                num_scalar_prefetch=0,
                grid=(grid_m, grid_n, grid_k),
                in_specs=[
                    pl.BlockSpec((TM, TK), lambda i, j, k: (i, k)),
                    pl.BlockSpec((TK, TN), lambda i, j, k: (k, j)),
                    pl.BlockSpec((1, TN), lambda i, j, k: (0, j)),
                ],
                out_specs=pl.BlockSpec((TM, TN), lambda i, j, k: (i, j)),
                scratch_shapes=[pltpu.VMEM((TM, TN), jnp.float32)],
            ),
            compiler_params=compiler_params_3d,
        )(xm, wt, bb)

    return out_flat[:M, :N].reshape(B, C, out_size, out_size)


# ----------------------------------------------------------------------------
# References
# ----------------------------------------------------------------------------
def projection2d_reference_bf16(x, w_t, b, out_size):
    """Pure-JAX reference with the same bf16-operand / f32-accumulate MXU numerics."""
    B, C, H, W = x.shape
    xm = x.reshape(B, C, H * W)
    y = jnp.einsum(
        "bck,kn->bcn",
        xm.astype(jnp.bfloat16),
        w_t.astype(jnp.bfloat16),
        preferred_element_type=jnp.float32,
    ) + b.reshape(1, 1, -1)
    return y.reshape(B, C, out_size, out_size)


def projection2d_reference_f32(x, w_t, b, out_size):
    """Full-f32 reference (matches the tiny-problem XLA fallback path)."""
    B, C, H, W = x.shape
    xm = x.reshape(B, C, H * W)
    y = jnp.einsum("bck,kn->bcn", xm, w_t) + b.reshape(1, 1, -1)
    return y.reshape(B, C, out_size, out_size)


if __name__ == "__main__":
    key = jax.random.PRNGKey(0)
    kx, kw, kb = jax.random.split(key, 3)

    B, in_ch, in_size, out_size = 2, 4, 16, 8
    K = in_size ** 2
    N = out_size ** 2

    x = jax.random.normal(kx, (B, in_ch, in_size, in_size), jnp.float32)
    # PyTorch nn.Linear init: U(-1/sqrt(in), 1/sqrt(in)); weight passed transposed (in, out).
    bound = 1.0 / math.sqrt(K)
    w_t = jax.random.uniform(kw, (K, N), jnp.float32, -bound, bound)
    b = jax.random.uniform(kb, (1, N), jnp.float32, -bound, bound)

    # 1) Force the Pallas path (so the kernel is exercised even at this tiny size)
    #    and compare against a reference using the same bf16-MXU numerics.
    out_pallas = projection2d_pallas(x, w_t, b, out_size, force_pallas=True)
    out_pallas = jax.block_until_ready(out_pallas)
    assert out_pallas.shape == (B, in_ch, out_size, out_size)
    ref_bf16 = projection2d_reference_bf16(x, w_t, b, out_size)
    np.testing.assert_allclose(np.asarray(out_pallas), np.asarray(ref_bf16),
                               atol=1e-3, rtol=1e-3)

    # 2) Default (auto) path — takes the XLA fallback at this tiny size — checked
    #    against the full-f32 reference.
    out_auto = projection2d_pallas(x, w_t, b, out_size)
    out_auto = jax.block_until_ready(out_auto)
    ref_f32 = projection2d_reference_f32(x, w_t, b, out_size)
    np.testing.assert_allclose(np.asarray(out_auto), np.asarray(ref_f32),
                               atol=1e-3, rtol=1e-3)

    print("KERNEL_OK")
</pallas_src>

<mosaic_0001>
module attributes {stable_mosaic.version = 11 : i64} {
  func.func @_proj_kernel_noacc(%arg0: i32, %arg1: i32, %arg2: memref<128x256xbf16, #tpu.memory_space<vmem>>, %arg3: memref<256x128xbf16, #tpu.memory_space<vmem>>, %arg4: memref<1x128xf32, #tpu.memory_space<vmem>>, %arg5: memref<128x128xf32, #tpu.memory_space<vmem>>) attributes {dimension_semantics = [#tpu.dimension_semantics<parallel>, #tpu.dimension_semantics<parallel>], iteration_bounds = array<i64: 1, 1>, scalar_prefetch = 0 : i64, scratch_operands = 0 : i64, tpu.core_type = #tpu.core_type<tc>, window_params = [{transform_indices = @transform_0, window_bounds = array<i64: 128, 256>}, {transform_indices = @transform_1, window_bounds = array<i64: 256, 128>}, {transform_indices = @transform_2, window_bounds = array<i64: 1, 128>}, {transform_indices = @transform_3, window_bounds = array<i64: 128, 128>}]} {
    %c0 = arith.constant 0 : index
    %c0_0 = arith.constant 0 : index
    %0 = vector.load %arg2[%c0, %c0_0] : memref<128x256xbf16, #tpu.memory_space<vmem>>, vector<128x256xbf16>
    %c0_1 = arith.constant 0 : index
    %c0_2 = arith.constant 0 : index
    %1 = vector.load %arg3[%c0_1, %c0_2] : memref<256x128xbf16, #tpu.memory_space<vmem>>, vector<256x128xbf16>
    %cst = arith.constant dense<0.000000e+00> : vector<128x128xf32>
    %2 = tpu.matmul %0, %1, %cst {dimension_numbers = #tpu.dot_dimension_numbers<[1], [0], [0], [1], [0, 0, 1, 1], [], []>} : vector<128x256xbf16>, vector<256x128xbf16>, vector<128x128xf32> -> vector<128x128xf32>
    %c0_3 = arith.constant 0 : index
    %c0_4 = arith.constant 0 : index
    %3 = vector.load %arg4[%c0_3, %c0_4] : memref<1x128xf32, #tpu.memory_space<vmem>>, vector<1x128xf32>
    %4 = vector.broadcast %3 : vector<1x128xf32> to vector<128x128xf32>
    %5 = arith.addf %2, %4 : vector<128x128xf32>
    %c0_5 = arith.constant 0 : index
    %c0_6 = arith.constant 0 : index
    %6 = vector.load %arg5[%c0_5, %c0_6] : memref<128x128xf32, #tpu.memory_space<vmem>>, vector<128x128xf32>
    tpu.vector_store %arg5[%c0_5, %c0_6], %5 {strides = array<i32>} : memref<128x128xf32, #tpu.memory_space<vmem>>, vector<128x128xf32>,
    return
  }
  func.func @transform_0(%arg0: i32, %arg1: i32) -> (i32, i32) {
    %c0_i32 = arith.constant 0 : i32
    %c0_i32_0 = arith.constant 0 : i32
    return %arg0, %c0_i32 : i32, i32
  }
  func.func @transform_1(%arg0: i32, %arg1: i32) -> (i32, i32) {
    %c0_i32 = arith.constant 0 : i32
    %c0_i32_0 = arith.constant 0 : i32
    return %c0_i32, %arg1 : i32, i32
  }
  func.func @transform_2(%arg0: i32, %arg1: i32) -> (i32, i32) {
    %c0_i32 = arith.constant 0 : i32
    %c0_i32_0 = arith.constant 0 : i32
    return %c0_i32, %arg1 : i32, i32
  }
  func.func @transform_3(%arg0: i32, %arg1: i32) -> (i32, i32) {
    %c0_i32 = arith.constant 0 : i32
    return %arg0, %arg1 : i32, i32
  }
}

</mosaic_0001>

<bundles_post_ra>
// kernel: tpu_custom_call.1
= control target key start
LH: loop header
LB: loop body
LE: loop exit
PB: predicated region body
PF: predicated region fallthrough
CT: control target
= control target key end

     0   :  { %8 = vsyncpa [#allocation3], 0  ;;  %s695_s0 = inlined_call_operand.hbm [shape: bf16[128,256], index: 0, kind: input, shape index: {}]   ;;  %s696_s1 = inlined_call_operand.hbm [shape: bf16[256,128], index: 1, kind: input, shape index: {}]   ;;  %s697_s2 = inlined_call_operand.vmem [shape: f32[1,128], index: 2, kind: input, shape index: {}]   ;;  %s698_s3 = inlined_call_operand.hbm [shape: f32[128,128], index: 3, kind: output, shape index: {}]  }
   0x1   :  { %9 = vsyncpa [#allocation6], 0 }
   0x2   :  { %10 = vsyncpa [#allocation4], 0  ;;  %s632_s12 = smov [#allocation2]  }
   0x3   :  { %s16_s13 = sshll.u32 %s632_s12, 4  ;;  %s17_s13 = int_to_ptr.vmem [resolvable:$true] %s16_s13 }
   0x4   :  { %s574_s14 = scalar_lea.vmem %s17_s13, 2048  ;;  %p579_p1 = scmp.lt.s32.totalorder %s17_s13, %s17_s13 }
   0x5   :  { %p575_p0 = scmp.ne.s32.totalorder %s17_s13, %s574_s14  ;;  %p580_p2 = scmp.lt.s32.totalorder %s574_s14, %s574_s14 }
   0x7   :  { %p581_p3 = por %p580_p2, %p579_p1 }
   0x9   :  { %p582_p4 = pnand %p581_p3, %p575_p0 }
   0xb   :  { %585 = shalt.err (!%p582_p4)
}
   0xc   :  { %s633_s15 = smov 128   ;;  %s634_s16 = smov 8  }
   0xd   :  { %22 = dma.hbm_to_vmem [thread:$0]  %s695_s0, 2048, %s17_s13, [#allocation3], %s633_s15, %s633_s15, %s634_s16  }
   0xe   :  { %s635_s19 = smov [#allocation5]  }
   0xf   :  { %s28_s20 = sshll.u32 %s635_s19, 4  ;;  %s29_s20 = int_to_ptr.vmem [resolvable:$true] %s28_s20 }
  0x10   :  { %s594_s21 = scalar_lea.vmem %s29_s20, 2048  ;;  %p599_p6 = scmp.lt.s32.totalorder %s29_s20, %s29_s20 }
  0x11   :  { %p595_p5 = scmp.ne.s32.totalorder %s29_s20, %s594_s21  ;;  %p600_p7 = scmp.lt.s32.totalorder %s594_s21, %s594_s21 }
  0x13   :  { %p601_p8 = por %p600_p7, %p599_p6 }
  0x15   :  { %p602_p9 = pnand %p601_p8, %p595_p5 }
  0x17   :  { %605 = shalt.err (!%p602_p9)
}
  0x18   :  { %s636_s22 = smov 64   ;;  %s637_s23 = smov 4  }
  0x19   :  { %34 = dma.hbm_to_vmem [thread:$0]  %s696_s1, 2048, %s29_s20, [#allocation6], %s636_s22, %s636_s22, %s637_s23  }
  0x1a   :  { %626 = dma.done.wait [#allocation3], 2048  }
  0x1b   :  { %627 = vsyncadd [#allocation3], 4294965248 }
  0x1c   :  { %628 = dma.done.wait [#allocation6], 2048  }
  0x1d   :  { %629 = vsyncadd [#allocation6], 4294965248  ;;  %v526_v0 = vld [vmem:[#allocation5 + $0x78] sm:$0xff]   ;;  %v528_v2 = vld [vmem:[#allocation5 + $0x70] sm:$0xff]  }
  0x1e   :  { %v527_v1 = vld [vmem:[#allocation5 + $0x38] sm:$0xff]   ;;  %439 = vmatprep.subr.bf16.mxu0 %v526_v0  ;;  %503 = vmatprep.subr.bf16.mxu1 %v526_v0  ;;  %v529_v3 = vld [vmem:[#allocation5 + $0x30] sm:$0xff]   ;;  %v530_v4 = vld [vmem:[#allocation5 + $0x68] sm:$0xff]  }
  0x1f   :  { %440 = vmatpush3.bf16.msra.mxu0 %v527_v1  ;;  %511 = vmatpush3.bf16.msra.mxu1 %v527_v1  ;;  %v531_v5 = vld [vmem:[#allocation5 + $0x28] sm:$0xff]   ;;  %v532_v6 = vld [vmem:[#allocation5 + $0x60] sm:$0xff]   ;;  %v534_v8 = vld [vmem:[#allocation5 + $0x58] sm:$0xff]  }
  0x20   :  { %441 = vmatprep.subr.bf16.mxu0 %v528_v2  ;;  %504 = vmatprep.subr.bf16.mxu1 %v528_v2  ;;  %v533_v7 = vld [vmem:[#allocation5 + $0x20] sm:$0xff]   ;;  %v535_v9 = vld [vmem:[#allocation5 + $0x18] sm:$0xff]   ;;  %v536_v10 = vld [vmem:[#allocation5 + $0x50] sm:$0xff]  }
  0x21   :  { %v544_v11 = vld [vmem:[#allocation2 + $0x4] ss:$8 sps:$4 sm:$0xff]   ;;  %v537_v13 = vld [vmem:[#allocation5 + $0x10] sm:$0xff]   ;;  %v542_v18 = vld [vmem:[#allocation2] ss:$8 sps:$4 sm:$0xff]  }
  0x22   :  { %v547_v12 = vld [vmem:[#allocation2 + $0x44] ss:$8 sps:$4 sm:$0xff]   ;;  %307 = vmatprep.mubr.bf16.mxu0 %v544_v11  ;;  %v545_v19 = vld [vmem:[#allocation2 + $0x40] ss:$8 sps:$4 sm:$0xff]   ;;  %v548_v20 = vld [vmem:[#allocation2 + $0x14] ss:$8 sps:$4 sm:$0xff]  }
  0x23   :  { %442 = vmatpush3.bf16.msra.mxu0 %v529_v3  ;;  %512 = vmatpush3.bf16.msra.mxu1 %v529_v3  ;;  %v538_v14 = vld [vmem:[#allocation5 + $0x48] sm:$0xff]   ;;  %v540_v16 = vld [vmem:[#allocation5 + $0x40] sm:$0xff]   ;;  %v550_v21 = vld [vmem:[#allocation2 + $0x54] ss:$8 sps:$4 sm:$0xff]  }
  0x24   :  { %443 = vmatprep.subr.bf16.mxu0 %v530_v4  ;;  %505 = vmatprep.subr.bf16.mxu1 %v530_v4  ;;  %v539_v15 = vld [vmem:[#allocation5 + $0x8] sm:$0xff]   ;;  %v541_v17 = vld [vmem:[#allocation5] sm:$0xff]   ;;  %v552_v22 = vld [vmem:[#allocation2 + $0x10] ss:$8 sps:$4 sm:$0xff]  }
  0x25   :  { %339 = vmatprep.mubr.bf16.mxu1 %v547_v12  ;;  %v553_v23 = vld [vmem:[#allocation2 + $0x50] ss:$8 sps:$4 sm:$0xff]   ;;  %v554_v24 = vld [vmem:[#allocation2 + $0x24] ss:$8 sps:$4 sm:$0xff]   ;;  %v558_v26 = vld [vmem:[#allocation2 + $0x20] ss:$8 sps:$4 sm:$0xff]  }
  0x26   :  { %v556_v25 = vld [vmem:[#allocation2 + $0x64] ss:$8 sps:$4 sm:$0xff]   ;;  %v559_v27 = vld [vmem:[#allocation2 + $0x60] ss:$8 sps:$4 sm:$0xff]   ;;  %v560_v28 = vld [vmem:[#allocation2 + $0x34] ss:$8 sps:$4 sm:$0xff]  }
  0x27   :  { %444 = vmatpush3.bf16.msra.mxu0 %v531_v5  ;;  %513 = vmatpush3.bf16.msra.mxu1 %v531_v5  ;;  %v562_v29 = vld [vmem:[#allocation2 + $0x74] ss:$8 sps:$4 sm:$0xff]   ;;  %v564_v30 = vld [vmem:[#allocation2 + $0x30] ss:$8 sps:$4 sm:$0xff]   ;;  %v671_v34 = vld [vmem:[%s697_s2] ss:$0 sm:$0xff] }
  0x28   :  { %445 = vmatprep.subr.bf16.mxu0 %v532_v6  ;;  %506 = vmatprep.subr.bf16.mxu1 %v532_v6  ;;  %v565_v31 = vld [vmem:[#allocation2 + $0x70] ss:$8 sps:$4 sm:$0xff]   ;;  %s638_s2 = smov [#allocation7]  }
  0x29   :  { %s393_s26 = sshll.u32 %s638_s2, 4  ;;  %s394_s26 = int_to_ptr.vmem [resolvable:$true] %s393_s26 }
  0x2a   :  { %s606_s27 = scalar_lea.vmem %s394_s26, 2048  ;;  %p611_p11 = scmp.lt.s32.totalorder %s394_s26, %s394_s26 }
  0x2b   :  { %446 = vmatpush3.bf16.msra.mxu0 %v533_v7  ;;  %514 = vmatpush3.bf16.msra.mxu1 %v533_v7  ;;  %p607_p10 = scmp.ne.s32.totalorder %s394_s26, %s606_s27  ;;  %p612_p12 = scmp.lt.s32.totalorder %s606_s27, %s606_s27 }
  0x2c   :  { %447 = vmatprep.subr.bf16.mxu0 %v534_v8  ;;  %507 = vmatprep.subr.bf16.mxu1 %v534_v8 }
  0x2d   :  { %p613_p13 = por %p612_p12, %p611_p11 }
  0x2f   :  { %448 = vmatpush3.bf16.msra.mxu0 %v535_v9  ;;  %515 = vmatpush3.bf16.msra.mxu1 %v535_v9  ;;  %p614_p0 = pnand %p613_p13, %p607_p10 }
  0x30   :  { %449 = vmatprep.subr.bf16.mxu0 %v536_v10  ;;  %508 = vmatprep.subr.bf16.mxu1 %v536_v10 }
  0x33   :  { %450 = vmatpush3.bf16.msra.mxu0 %v537_v13  ;;  %516 = vmatpush3.bf16.msra.mxu1 %v537_v13 }
  0x34   :  { %451 = vmatprep.subr.bf16.mxu0 %v538_v14  ;;  %509 = vmatprep.subr.bf16.mxu1 %v538_v14 }
  0x37   :  { %452 = vmatpush3.bf16.msra.mxu0 %v539_v15  ;;  %517 = vmatpush3.bf16.msra.mxu1 %v539_v15 }
  0x38   :  { %453 = vmatprep.subr.bf16.mxu0 %v540_v16  ;;  %510 = vmatprep.subr.bf16.mxu1 %v540_v16 }
  0x3b   :  { %454 = vmatpush3.bf16.msra.mxu0 %v541_v17  ;;  %518 = vmatpush3.bf16.msra.mxu1 %v541_v17 }
  0x3e   :  { %308 = vmatmul.mubr.bf16.vlgmr.msra.gmra.mxu0 %v542_v18  ;;  %340 = vmatmul.mubr.bf16.vlgmr.msra.gmra.mxu1 %v545_v19 }
  0x3f   :  { %315 = vmatprep.mubr.bf16.mxu0 %v548_v20  ;;  %347 = vmatprep.mubr.bf16.mxu1 %v550_v21 }
  0x46   :  { %316 = vmatmul.mubr.bf16.gmra.mxu0 %v552_v22  ;;  %348 = vmatmul.mubr.bf16.gmra.mxu1 %v553_v23 }
  0x47   :  { %323 = vmatprep.mubr.bf16.mxu0 %v554_v24  ;;  %355 = vmatprep.mubr.bf16.mxu1 %v556_v25 }
  0x4e   :  { %324 = vmatmul.mubr.bf16.gmra.mxu0 %v558_v26  ;;  %356 = vmatmul.mubr.bf16.gmra.mxu1 %v559_v27 }
  0x4f   :  { %331 = vmatprep.mubr.bf16.mxu0 %v560_v28  ;;  %363 = vmatprep.mubr.bf16.mxu1 %v562_v29 }
  0x56   :  { %332 = vmatmul.mubr.bf16.gmra.mxu0 %v564_v30  ;;  %364 = vmatmul.mubr.bf16.gmra.mxu1 %v565_v31 }
  0xfe   :  { %v455_v32 = vpop.f32.mrf.mxu0  ;;  %v479_v33 = vpop.f32.mrf.mxu1 }
 0x100   :  { %v456_v35 = vpop.f32.mrf.mxu0  ;;  %v480_v36 = vpop.f32.mrf.mxu1 }
 0x101   :  { %v457_v37 = vadd.f32 %v456_v35, %v455_v32  ;;  %v481_v38 = vadd.f32 %v480_v36, %v479_v33 }
 0x102   :  { %v458_v39 = vpop.f32.mrf.mxu0  ;;  %v482_v40 = vpop.f32.mrf.mxu1 }
 0x103   :  { %v310_v41 = vadd.f32 %v457_v37, %v671_v34  ;;  %v342_v42 = vadd.f32 %v481_v38, %v671_v34 }
 0x104   :  { %v459_v43 = vpop.f32.mrf.mxu0  ;;  %v483_v44 = vpop.f32.mrf.mxu1 }
 0x105   :  { %372 = vst [vmem:[#allocation7] sm:$0xff] %v310_v41  ;;  %380 = vst [vmem:[#allocation7 + $0x40] sm:$0xff] %v342_v42  ;;  %v460_v45 = vadd.f32 %v459_v43, %v458_v39  ;;  %v484_v46 = vadd.f32 %v483_v44, %v482_v40 }
 0x106   :  { %v461_v47 = vpop.f32.mrf.mxu0  ;;  %v485_v48 = vpop.f32.mrf.mxu1 }
 0x107   :  { %v313_v49 = vadd.f32 %v460_v45, %v671_v34  ;;  %v345_v50 = vadd.f32 %v484_v46, %v671_v34 }
 0x108   :  { %v462_v51 = vpop.f32.mrf.mxu0  ;;  %v486_v52 = vpop.f32.mrf.mxu1 }
 0x109   :  { %373 = vst [vmem:[#allocation7 + $0x8] sm:$0xff] %v313_v49  ;;  %381 = vst [vmem:[#allocation7 + $0x48] sm:$0xff] %v345_v50  ;;  %v463_v53 = vadd.f32 %v462_v51, %v461_v47  ;;  %v487_v54 = vadd.f32 %v486_v52, %v485_v48 }
 0x10a   :  { %v464_v55 = vpop.f32.mrf.mxu0  ;;  %v488_v56 = vpop.f32.mrf.mxu1 }
 0x10b   :  { %v318_v57 = vadd.f32 %v463_v53, %v671_v34  ;;  %v350_v58 = vadd.f32 %v487_v54, %v671_v34 }
 0x10c   :  { %v465_v59 = vpop.f32.mrf.mxu0  ;;  %v489_v60 = vpop.f32.mrf.mxu1 }
 0x10d   :  { %374 = vst [vmem:[#allocation7 + $0x10] sm:$0xff] %v318_v57  ;;  %382 = vst [vmem:[#allocation7 + $0x50] sm:$0xff] %v350_v58  ;;  %v466_v61 = vadd.f32 %v465_v59, %v464_v55  ;;  %v490_v62 = vadd.f32 %v489_v60, %v488_v56 }
 0x10e   :  { %v467_v63 = vpop.f32.mrf.mxu0  ;;  %v491_v0 = vpop.f32.mrf.mxu1 }
 0x10f   :  { %v321_v1 = vadd.f32 %v466_v61, %v671_v34  ;;  %v353_v2 = vadd.f32 %v490_v62, %v671_v34 }
 0x110   :  { %v468_v3 = vpop.f32.mrf.mxu0  ;;  %v492_v4 = vpop.f32.mrf.mxu1 }
 0x111   :  { %375 = vst [vmem:[#allocation7 + $0x18] sm:$0xff] %v321_v1  ;;  %383 = vst [vmem:[#allocation7 + $0x58] sm:$0xff] %v353_v2  ;;  %v469_v5 = vadd.f32 %v468_v3, %v467_v63  ;;  %v493_v6 = vadd.f32 %v492_v4, %v491_v0 }
 0x112   :  { %v470_v7 = vpop.f32.mrf.mxu0  ;;  %v494_v8 = vpop.f32.mrf.mxu1 }
 0x113   :  { %v326_v9 = vadd.f32 %v469_v5, %v671_v34  ;;  %v358_v10 = vadd.f32 %v493_v6, %v671_v34 }
 0x114   :  { %v471_v11 = vpop.f32.mrf.mxu0  ;;  %v495_v12 = vpop.f32.mrf.mxu1 }
 0x115   :  { %376 = vst [vmem:[#allocation7 + $0x20] sm:$0xff] %v326_v9  ;;  %384 = vst [vmem:[#allocation7 + $0x60] sm:$0xff] %v358_v10  ;;  %v472_v13 = vadd.f32 %v471_v11, %v470_v7  ;;  %v496_v14 = vadd.f32 %v495_v12, %v494_v8 }
 0x116   :  { %v473_v15 = vpop.f32.mrf.mxu0  ;;  %v497_v16 = vpop.f32.mrf.mxu1 }
 0x117   :  { %v329_v17 = vadd.f32 %v472_v13, %v671_v34  ;;  %v361_v18 = vadd.f32 %v496_v14, %v671_v34 }
 0x118   :  { %v474_v19 = vpop.f32.mrf.mxu0  ;;  %v498_v20 = vpop.f32.mrf.mxu1 }
 0x119   :  { %377 = vst [vmem:[#allocation7 + $0x28] sm:$0xff] %v329_v17  ;;  %385 = vst [vmem:[#allocation7 + $0x68] sm:$0xff] %v361_v18  ;;  %v475_v21 = vadd.f32 %v474_v19, %v473_v15  ;;  %v499_v22 = vadd.f32 %v498_v20, %v497_v16 }
 0x11a   :  { %v476_v23 = vpop.f32.mrf.mxu0  ;;  %v500_v24 = vpop.f32.mrf.mxu1 }
 0x11b   :  { %v334_v25 = vadd.f32 %v475_v21, %v671_v34  ;;  %v366_v26 = vadd.f32 %v499_v22, %v671_v34 }
 0x11c   :  { %v477_v27 = vpop.f32.mrf.mxu0  ;;  %v501_v28 = vpop.f32.mrf.mxu1 }
 0x11d   :  { %378 = vst [vmem:[#allocation7 + $0x30] sm:$0xff] %v334_v25  ;;  %386 = vst [vmem:[#allocation7 + $0x70] sm:$0xff] %v366_v26  ;;  %v478_v29 = vadd.f32 %v477_v27, %v476_v23  ;;  %v502_v30 = vadd.f32 %v501_v28, %v500_v24 }
 0x11f   :  { %v337_v31 = vadd.f32 %v478_v29, %v671_v34  ;;  %v369_v32 = vadd.f32 %v502_v30, %v671_v34 }
 0x121   :  { %379 = vst [vmem:[#allocation7 + $0x38] sm:$0xff] %v337_v31  ;;  %387 = vst [vmem:[#allocation7 + $0x78] sm:$0xff] %v369_v32 }
 0x122   :  { %617 = shalt.err (!%p614_p0)
}
 0x123   :  { %399 = dma.vmem_to_hbm [thread:$0]  %s394_s26, 2048, %s698_s3, [#allocation4], %s633_s15, %s633_s15, %s634_s16  }
 0x124   :  { %630 = dma.done.wait [#allocation4], 2048  }
 0x125   :  { %631 = vsyncadd [#allocation4], 4294965248 }
 0x126   :  { %403 = vsyncpa [#allocation3], 1 }
 0x127   :  { %404 = vsyncpa [#allocation6], 1 }
 0x128   :  { %405 = vsyncpa [#allocation4], 1 }

</bundles_post_ra>
